<compile_context>
chip_gen: v6e
topology: v6e:2x2x1
jax: 0.10.0
libtpu: 0.0.40
codegen_flags: <defaults>
</compile_context>

<pallas_src>
import jax
import jax.numpy as jnp
from jax.experimental import pallas as pl
from jax.experimental.pallas import tpu as pltpu


def _round_up(x, m):
    return (x + m - 1) // m * m


def _tpu_defaults():
    """Return (row-tile cap, is_v7x) based on the local chip generation."""
    try:
        kind = jax.devices()[0].device_kind.lower()
    except Exception:
        return 256, False
    is_v5e = ("v5e" in kind) or ("v5 lite" in kind) or ("v5litepod" in kind)
    return (128 if is_v5e else 256), ("v7" in kind)


def desc_head_kernel(x_ref, w_ref, b_ref, o_ref):
    """One grid step = one tile of block_n descriptions.

    x_ref : VMEM (block_n, H)   -- EOS-pooled hidden rows (compute dtype)
    w_ref : VMEM (H, E_pad)     -- text_projection weight, transposed (compute dtype)
    b_ref : VMEM (1, E_pad)     -- text_projection bias (f32, zero-padded)
    o_ref : VMEM (block_n, E_pad) -- L2-normalized embeddings (out dtype)
    """
    # 2) Linear projection on the MXU with f32 accumulation.
    proj = jnp.dot(x_ref[...], w_ref[...], preferred_element_type=jnp.float32)
    proj = proj + b_ref[...]

    # 3) L2 normalize along the embedding dim (matches F.normalize, eps=1e-12).
    #    Clamping ||x||^2 at eps^2 == clamping ||x|| at eps (sqrt is monotone);
    #    rsqrt runs on the EUP slot, the multiply on the VPU (no vector div).
    sq = jnp.sum(proj * proj, axis=-1, keepdims=True)
    inv_nrm = jax.lax.rsqrt(jnp.maximum(sq, 1e-24))
    o_ref[...] = (proj * inv_nrm).astype(o_ref.dtype)


def description_encoder_head(last_hidden_state, token_ids, w_t, b, *,
                             block_n=None,
                             compute_dtype=jnp.bfloat16,
                             out_dtype=jnp.float32):
    """Pallas-backed equivalent of the DescriptionEncoder forward head.

    last_hidden_state : (N, L, H) f32   -- stand-in for the HF encoder output
    token_ids         : (N, L)   int32  -- stand-in for tokenized descriptions
    w_t               : (H, E)   f32    -- text_projection.weight.T
    b                 : (E,)     f32    -- text_projection.bias
    returns           : (N, E)   out_dtype -- L2-normalized description embeddings
    """
    N, L, H = last_hidden_state.shape
    E = w_t.shape[1]

    # 1) EOS pooling in the wrapper: argmax over token ids (CLIP's EOS id is the
    #    numerically largest) + row gather.  Only the (N, H) gathered rows reach
    #    the kernel, so HBM traffic is N*H instead of N*L*H.
    eos_pos = jnp.argmax(token_ids, axis=1)
    ctx = last_hidden_state[jnp.arange(N), eos_pos]            # (N, H)

    # Row-tile size: sublane-packing multiple of the compute dtype, capped per
    # chip generation (128 on v5e, 256 on v6e/v7x); on v7x make sure the single
    # parallel grid axis has >= 2 steps so both TensorCores are used.
    row_mult = 8 * max(1, 4 // jnp.dtype(compute_dtype).itemsize)
    cap, is_v7 = _tpu_defaults()
    if block_n is None:
        block_n = min(_round_up(N, row_mult), cap)
        if is_v7 and pl.cdiv(N, block_n) < 2 and N > row_mult:
            block_n = _round_up(pl.cdiv(N, 2), row_mult)
    else:
        block_n = _round_up(block_n, row_mult)

    # Lane-dense output stores: pad the (frozen) projection to E multiple of 128
    # (no-op for real CLIP E=512/768); zero columns don't change the L2 norm.
    E_pad = _round_up(E, 128)
    if E_pad != E:
        w_t = jnp.pad(w_t, ((0, 0), (0, E_pad - E)))
        b = jnp.pad(b, (0, E_pad - E))

    # bf16 (default) halves DMA bytes / VMEM for rows + weight; accumulate in f32.
    ctx = ctx.astype(compute_dtype)
    w = w_t.astype(compute_dtype)
    b2 = b.reshape(1, E_pad).astype(jnp.float32)

    # Partial trailing block: OOB reads are garbage rows, but rows are fully
    # independent (row-wise matmul + row-wise normalize) and their OOB stores
    # are dropped, so nothing leaks into kept rows.
    grid = pl.cdiv(N, block_n)

    itemsize = jnp.dtype(compute_dtype).itemsize
    out_itemsize = jnp.dtype(out_dtype).itemsize
    cost = pl.CostEstimate(
        flops=2 * grid * block_n * H * E_pad,
        transcendentals=grid * block_n,                         # one rsqrt per row
        bytes_accessed=(grid * block_n * H + H * E_pad) * itemsize
                       + E_pad * 4 + N * E_pad * out_itemsize,
    )

    out = pl.pallas_call(
        desc_head_kernel,
        out_shape=jax.ShapeDtypeStruct((N, E_pad), out_dtype),
        grid_spec=pltpu.PrefetchScalarGridSpec(
            num_scalar_prefetch=0,
            grid=(grid,),
            in_specs=[
                # gathered EOS rows, tiled over the batch
                pl.BlockSpec((block_n, H), lambda i: (i, 0)),
                # projection weight, resident across the grid (constant index_map)
                pl.BlockSpec((H, E_pad), lambda i: (0, 0)),
                # projection bias, resident across the grid
                pl.BlockSpec((1, E_pad), lambda i: (0, 0)),
            ],
            # lane-dense 2-D output block (E_pad % 128 == 0 -> unmasked vst)
            out_specs=pl.BlockSpec((block_n, E_pad), lambda i: (i, 0)),
        ),
        compiler_params=pltpu.CompilerParams(
            dimension_semantics=("parallel",)),   # megacore / 2-TC sharding on v7x
        cost_estimate=cost,
    )(ctx, w, b2)

    if E_pad != E:
        out = out[:, :E]
    return out


def reference_head(last_hidden_state, token_ids, w_t, b):
    """Pure-JAX reference mirroring the PyTorch forward."""
    N = last_hidden_state.shape[0]
    eos_pos = jnp.argmax(token_ids, axis=1)
    ctx = last_hidden_state[jnp.arange(N), eos_pos]          # (N, H)
    proj = ctx @ w_t + b                                      # (N, E)
    nrm = jnp.maximum(jnp.linalg.norm(proj, axis=1, keepdims=True), 1e-12)
    return proj / nrm


if __name__ == "__main__":
    # Small stand-in shapes:
    #   BATCH_SIZE = 2 meshes, descs_per_mesh = 4  -> N = 8 descriptions
    #   model_max_length L = 16, hidden_size H = 32, joint_embed_dim E = 16
    N, L, H, E = 8, 16, 32, 16
    EOS_TOKEN_ID = 49407  # CLIP eos token id (largest in vocab)

    key = jax.random.PRNGKey(0)
    k_hid, k_len, k_tok, k_w, k_b = jax.random.split(key, 5)

    # Synthetic "last_hidden_state" (stands in for the frozen HF encoder output).
    last_hidden_state = jax.random.normal(k_hid, (N, L, H), dtype=jnp.float32)

    # Synthetic tokenized descriptions: random ids, EOS at position len-1, 0-padding.
    lens = jax.random.randint(k_len, (N,), 3, L)                       # lengths in [3, L)
    ids = jax.random.randint(k_tok, (N, L), 1, 1000).astype(jnp.int32)
    pos = jnp.arange(L)[None, :]
    token_ids = jnp.where(pos < (lens[:, None] - 1), ids, 0)
    token_ids = jnp.where(pos == (lens[:, None] - 1), EOS_TOKEN_ID, token_ids)
    token_ids = token_ids.astype(jnp.int32)

    # Deterministic text_projection parameters (torch Linear: (E, H) weight).
    w = jax.random.normal(k_w, (E, H), dtype=jnp.float32) * (1.0 / jnp.sqrt(H))
    b = jax.random.normal(k_b, (E,), dtype=jnp.float32) * 0.01
    w_t = w.T  # (H, E) layout used by the kernel

    # One jit so argmax/gather/cast fuse with the pallas_call.
    head = jax.jit(description_encoder_head,
                   static_argnames=("block_n", "compute_dtype", "out_dtype"))

    # f32 compute (exact check), bf16 compute (perf config), bf16 compute+output.
    out_f32 = head(last_hidden_state, token_ids, w_t, b,
                   compute_dtype=jnp.float32, out_dtype=jnp.float32)
    out_bf16 = head(last_hidden_state, token_ids, w_t, b,
                    compute_dtype=jnp.bfloat16, out_dtype=jnp.float32)
    out_bf16o = head(last_hidden_state, token_ids, w_t, b,
                     compute_dtype=jnp.bfloat16, out_dtype=jnp.bfloat16)
    out_f32, out_bf16, out_bf16o = jax.block_until_ready(
        (out_f32, out_bf16, out_bf16o))

    ref = reference_head(last_hidden_state, token_ids, w_t, b)
    assert out_f32.shape == (N, E), out_f32.shape
    assert out_bf16.shape == (N, E), out_bf16.shape
    assert out_bf16o.shape == (N, E), out_bf16o.shape
    assert jnp.allclose(out_f32, ref, atol=1e-5, rtol=1e-5), "f32 mismatch vs reference"
    assert jnp.allclose(out_bf16, ref, atol=2e-2, rtol=2e-2), "bf16 mismatch vs reference"
    assert jnp.allclose(out_bf16o.astype(jnp.float32), ref, atol=3e-2, rtol=3e-2), \
        "bf16-output mismatch vs reference"
    assert bool(jnp.all(jnp.isfinite(out_bf16))), "non-finite values in output"

    print("KERNEL_OK")
</pallas_src>

<mosaic_0001>
module attributes {stable_mosaic.version = 11 : i64} {
  func.func @desc_head_kernel(%arg0: i32, %arg1: memref<8x32xf32, #tpu.memory_space<vmem>>, %arg2: memref<32x128xf32, #tpu.memory_space<vmem>>, %arg3: memref<1x128xf32, #tpu.memory_space<vmem>>, %arg4: memref<8x128xf32, #tpu.memory_space<vmem>>) attributes {dimension_semantics = [#tpu.dimension_semantics<parallel>], iteration_bounds = array<i64: 1>, scalar_prefetch = 0 : i64, scratch_operands = 0 : i64, tpu.core_type = #tpu.core_type<tc>, window_params = [{transform_indices = @transform_0, window_bounds = array<i64: 8, 32>}, {pipeline_mode = #tpu.pipeline_mode<synchronous>, transform_indices = @transform_1, window_bounds = array<i64: 32, 128>}, {pipeline_mode = #tpu.pipeline_mode<synchronous>, transform_indices = @transform_2, window_bounds = array<i64: 1, 128>}, {transform_indices = @transform_3, window_bounds = array<i64: 8, 128>}]} {
    %c0 = arith.constant 0 : index
    %c0_0 = arith.constant 0 : index
    %0 = vector.load %arg1[%c0, %c0_0] : memref<8x32xf32, #tpu.memory_space<vmem>>, vector<8x32xf32>
    %c0_1 = arith.constant 0 : index
    %c0_2 = arith.constant 0 : index
    %1 = vector.load %arg2[%c0_1, %c0_2] : memref<32x128xf32, #tpu.memory_space<vmem>>, vector<32x128xf32>
    %cst = arith.constant dense<0.000000e+00> : vector<8x128xf32>
    %2 = tpu.matmul %0, %1, %cst {dimension_numbers = #tpu.dot_dimension_numbers<[1], [0], [0], [1], [0, 0, 1, 1], [], []>} : vector<8x32xf32>, vector<32x128xf32>, vector<8x128xf32> -> vector<8x128xf32>
    %c0_3 = arith.constant 0 : index
    %c0_4 = arith.constant 0 : index
    %3 = vector.load %arg3[%c0_3, %c0_4] : memref<1x128xf32, #tpu.memory_space<vmem>>, vector<1x128xf32>
    %4 = vector.broadcast %3 : vector<1x128xf32> to vector<8x128xf32>
    %5 = arith.addf %2, %4 : vector<8x128xf32>
    %6 = arith.mulf %5, %5 : vector<8x128xf32>
    %cst_5 = arith.constant dense<0.000000e+00> : vector<8xf32>
    %7 = vector.multi_reduction <add>, %6, %cst_5 [1] : vector<8x128xf32> to vector<8xf32>
    %8 = vector.shape_cast %7 : vector<8xf32> to vector<8x1xf32>
    %cst_6 = arith.constant 1.000000e-24 : f32
    %9 = vector.broadcast %cst_6 : f32 to vector<8x1xf32>
    %10 = arith.maximumf %8, %9 : vector<8x1xf32>
    %11 = math.rsqrt %10 : vector<8x1xf32>
    %12 = vector.broadcast %11 : vector<8x1xf32> to vector<8x128xf32>
    %13 = arith.mulf %5, %12 : vector<8x128xf32>
    %c0_7 = arith.constant 0 : index
    %c0_8 = arith.constant 0 : index
    %14 = vector.load %arg4[%c0_7, %c0_8] : memref<8x128xf32, #tpu.memory_space<vmem>>, vector<8x128xf32>
    tpu.vector_store %arg4[%c0_7, %c0_8], %13 {strides = array<i32>} : memref<8x128xf32, #tpu.memory_space<vmem>>, vector<8x128xf32>,
    return
  }
  func.func @transform_0(%arg0: i32) -> (i32, i32) {
    %c0_i32 = arith.constant 0 : i32
    %c0_i32_0 = arith.constant 0 : i32
    return %arg0, %c0_i32 : i32, i32
  }
  func.func @transform_1(%arg0: i32) -> (i32, i32) {
    %c0_i32 = arith.constant 0 : i32
    %c0_i32_0 = arith.constant 0 : i32
    %c0_i32_1 = arith.constant 0 : i32
    return %c0_i32, %c0_i32_0 : i32, i32
  }
  func.func @transform_2(%arg0: i32) -> (i32, i32) {
    %c0_i32 = arith.constant 0 : i32
    %c0_i32_0 = arith.constant 0 : i32
    %c0_i32_1 = arith.constant 0 : i32
    return %c0_i32, %c0_i32_0 : i32, i32
  }
  func.func @transform_3(%arg0: i32) -> (i32, i32) {
    %c0_i32 = arith.constant 0 : i32
    %c0_i32_0 = arith.constant 0 : i32
    return %arg0, %c0_i32 : i32, i32
  }
}

</mosaic_0001>

<bundles_post_ra>
// kernel: description_encoder_head.1
= control target key start
LH: loop header
LB: loop body
LE: loop exit
PB: predicated region body
PF: predicated region fallthrough
CT: control target
= control target key end

     0   :  { %v167_v1 = vmov 0.0   ;;  %vm168_vm0 = vmmov 0   ;;  %s211_s0 = inlined_call_operand.vmem [shape: f32[8,32], index: 0, kind: input, shape index: {}]   ;;  %s212_s1 = inlined_call_operand.vmem [shape: f32[32,128], index: 1, kind: input, shape index: {}]   ;;  %s213_s2 = inlined_call_operand.vmem [shape: f32[1,128], index: 2, kind: input, shape index: {}]   ;;  %s214_s3 = inlined_call_operand.hbm [shape: f32[8,128], index: 3, kind: output, shape index: {}]  }
   0x1   :  { %v19_v0 = vld [vmem:[%s212_s1 + $0x18] sm:$0xff]  ;;  %129 = vmatprep.subr.mxu0 %v167_v1  ;;  %v18_v2 = vld [vmem:[%s212_s1 + $0x10] sm:$0xff]  ;;  %137 = vmatprep.mubr.msk.f32.mxu0 %vm168_vm0, %v167_v1 }
   0x2   :  { %130 = vmatpush3.msra.mxu0 %v19_v0 }
   0x3   :  { %8 = vsyncpa [#allocation3], 0  ;;  %131 = vmatprep.subr.mxu0 %v167_v1  ;;  %v17_v3 = vld [vmem:[%s212_s1 + $0x8] sm:$0xff]  ;;  %v16_v4 = vld [vmem:[%s212_s1] sm:$0xff]  ;;  %vm27_vm1 = vcmask 261120   ;;  %s169_s1 = smov [#allocation2]  }
   0x4   :  { %132 = vmatpush3.msra.mxu0 %v18_v2  ;;  %v15_v5 = vld [vmem:[%s211_s0] sm:$0xff]  ;;  %s114_s24 = sshll.u32 %s169_s1, 4  ;;  %s115_s24 = int_to_ptr.vmem [resolvable:$true] %s114_s24 }
   0x5   :  { %133 = vmatprep.subr.mxu0 %v167_v1  ;;  %v122_v6 = vld [vmem:[%s213_s2] ss:$0 sm:$0xff]  ;;  %s145_s0 = scalar_lea.vmem %s115_s24, 128  ;;  %p150_p1 = scmp.lt.s32.totalorder %s115_s24, %s115_s24 }
   0x6   :  { %134 = vmatpush3.msra.mxu0 %v17_v3  ;;  %p146_p0 = scmp.ne.s32.totalorder %s115_s24, %s145_s0  ;;  %p151_p2 = scmp.lt.s32.totalorder %s145_s0, %s145_s0 }
   0x7   :  { %135 = vmatprep.subr.mxu0 %v167_v1 }
   0x8   :  { %136 = vmatpush3.msra.mxu0 %v16_v4  ;;  %p152_p3 = por %p151_p2, %p150_p1 }
   0x9   :  { %138 = vmatmul.mubr.msk.f32.vlgmr.msra.gmra.mxu0 %vm27_vm1, %v15_v5 }
   0xa   :  { %p153_p4 = pnand %p152_p3, %p146_p0 }
  0xc9   :  { %v97_v7 = vpop.f32.mrf.mxu0 }
  0xca   :  { %v98_v8 = vadd.f32 %v122_v6, %v97_v7 }
  0xcb   :  { %v139_v9 = vpop.f32.mrf.mxu0 }
  0xcc   :  { %v101_v10 = vmul.f32 %v98_v8, %v98_v8 }
  0xce   :  { %102 = vadd.xlane.f32.xlu0 %v101_v10 }
 0x157   :  { %v103_v11 = vpop.xlane.xlu0 %102 }
 0x158   :  { %v104_v12 = vmax.f32 %v103_v11, 1e-24 }
 0x15a   :  { %143 = vrsqrt.f32 %v104_v12 }
 0x167   :  { %v144_v13 = vpop.eup %143 }
 0x168   :  { %v106_v14 = vmul.f32 %v144_v13, %v98_v8 }
 0x16a   :  { %107 = vst [vmem:[#allocation2] sm:$0xff] %v106_v14 }
 0x16b   :  { %156 = shalt.err (!%p153_p4)
}
 0x16c   :  { %117 = dma.vmem_to_hbm [thread:$0]  %s115_s24, 128, %s214_s3, [#allocation3]  }
 0x16d   :  { %165 = dma.done.wait [#allocation3], 128  }
 0x16e   :  { %166 = vsyncadd [#allocation3], 4294967168 }
 0x16f   :  { %121 = vsyncpa [#allocation3], 1 }

</bundles_post_ra>
